<compile_context>
chip_gen: v6e
topology: v6e:2x2x1
jax: 0.10.0
libtpu: 0.0.40
codegen_flags: <defaults>
</compile_context>

<pallas_src>
import functools

import jax
import jax.numpy as jnp
from jax import lax
from jax.experimental import pallas as pl
from jax.experimental.pallas import tpu as pltpu


def spectrum_kernel(x_ref, wsq_ref, bsq_ref, wc_ref, wr_ref, bo_ref, mask_ref,
                    o_ref, *, W, HWp, Ce1, nb):
    """Processes `nb` images per grid step.  Activations laid out (C, HWp)."""
    cd = wsq_ref.dtype                      # MXU operand dtype (f32 or bf16)

    # Hoist the (tiny, grid-resident) weights / biases out of the image loop.
    wsq = wsq_ref[...]                      # (Cp, Cin)   cd
    wc = wc_ref[...]                        # (Ctot, Cp)  cd  (expand1x1 ++ 3x3 center tap)
    bsq = bsq_ref[...]                      # (Cp, 1)     f32
    bo = bo_ref[...]                        # (Ctot, 1)   f32

    for b in range(nb):
        x = x_ref[b]                        # (Cin, HWp)  cd

        # ---- squeeze 1x1 conv + ReLU: (Cp, Cin) @ (Cin, HWp) ----
        s = jnp.dot(wsq, x, preferred_element_type=jnp.float32)
        s = jnp.maximum(s + bsq, 0.0)       # (Cp, HWp) f32
        s_cd = s.astype(cd)                 # cast once; rolls/masks/dots run in cd

        # ---- expand1x1 fused with the 3x3 center tap: (Ctot, Cp) @ (Cp, HWp) ----
        center = jnp.dot(wc, s_cd, preferred_element_type=jnp.float32)  # (Ctot, HWp)

        # ---- 8 non-center 3x3 taps: per-tap accumulate (no im2col scratch) ----
        # out[h, w] += W3[dy+1, dx+1] @ s[h+dy, w+dx] (zero padded).  Shifts
        # are lane rolls of the flattened spatial axis; wrap-around and
        # out-of-image contributions are zeroed by the precomputed (1, HWp)
        # border mask for that tap.  The center tap is handled above.
        acc = center[Ce1:] + bo[Ce1:]       # (Ce3, HWp) f32 running accumulator
        t = 0
        for dy in (-1, 0, 1):
            for dx in (-1, 0, 1):
                if dy == 0 and dx == 0:
                    continue
                off = dy * W + dx
                # shifted[:, p] = s_cd[:, (p + off) % HWp]
                shifted = pltpu.roll(s_cd, shift=(-off) % HWp, axis=1)
                tapv = shifted * mask_ref[t]                 # (Cp, HWp) cd
                acc = acc + jnp.dot(wr_ref[t], tapv,
                                    preferred_element_type=jnp.float32)
                t += 1

        # ---- bias + ReLU epilogue; single concatenated full-block store ----
        e1 = jnp.maximum(center[:Ce1] + bo[:Ce1], 0.0)       # (Ce1, HWp)
        e3 = jnp.maximum(acc, 0.0)                           # (Ce3, HWp)
        o_ref[b] = jnp.concatenate([e1, e3], axis=0).astype(o_ref.dtype)


def _pick_batch_block(n, max_block):
    """Largest divisor of n that is <= max_block (>= 1)."""
    nb = 1
    for d in range(1, min(n, max_block) + 1):
        if n % d == 0:
            nb = d
    return nb


def spectrum_forward(x_nchw, params, *, compute_dtype=jnp.float32, batch_block=8):
    """x_nchw: (N, Cin, H, W).  Returns (N, Ce1+Ce3, H, W) in x's dtype."""
    wsq, bsq, we1, be1, we3, be3 = params
    N, Cin, H, W = x_nchw.shape
    Csq = wsq.shape[-1]
    Ce1 = we1.shape[-1]
    Ce3 = we3.shape[-1]
    Ctot = Ce1 + Ce3
    HW = H * W
    HWp = ((HW + 127) // 128) * 128          # lane-dense spatial axis
    cd = jnp.dtype(compute_dtype)
    out_dtype = x_nchw.dtype

    # Pad the squeeze width so s's sublane extent is tile aligned (8 rows for
    # f32, 16 for bf16).  Padded s-rows are exactly zero (zero weight rows +
    # zero bias -> relu(0) = 0), so results match.
    align = 32 // cd.itemsize
    Cp = max(align, ((Csq + align - 1) // align) * align)
    pad_c = Cp - Csq

    nb = _pick_batch_block(N, batch_block)

    # (N, Cin, HW): a pure reshape of NCHW (no HBM transpose); pad the lane
    # axis to HWp and deliver the activation in the compute dtype so the
    # dominant input DMA is halved on the bf16 path.
    x = x_nchw.reshape(N, Cin, HW)
    if HWp != HW:
        x = jnp.pad(x, ((0, 0), (0, 0), (0, HWp - HW)))
    x = x.astype(cd)

    # Channel-major weights (tiny, prepared once at trace time).
    wsq_t = jnp.pad(jnp.transpose(wsq), ((0, pad_c), (0, 0))).astype(cd)      # (Cp, Cin)
    bsq_c = jnp.pad(bsq.reshape(Csq, 1), ((0, pad_c), (0, 0))).astype(jnp.float32)
    # expand1x1 fused with the 3x3 center tap.
    wc = jnp.pad(
        jnp.concatenate([jnp.transpose(we1), jnp.transpose(we3[1, 1])], axis=0),
        ((0, 0), (0, pad_c))).astype(cd)                                      # (Ctot, Cp)
    # 8 non-center taps, stacked along a leading axis in the kernel loop order.
    taps = []
    for dy in (-1, 0, 1):
        for dx in (-1, 0, 1):
            if dy == 0 and dx == 0:
                continue
            taps.append(jnp.pad(jnp.transpose(we3[dy + 1, dx + 1]),
                                ((0, 0), (0, pad_c))))                        # (Ce3, Cp)
    wr = jnp.stack(taps, axis=0).astype(cd)                                   # (8, Ce3, Cp)
    bo = jnp.concatenate([be1, be3]).reshape(Ctot, 1).astype(jnp.float32)     # (Ctot, 1)

    # Precomputed border / lane-padding masks (one per tap), hoisted out of
    # the kernel.  Masks come from the real (H, W); padded lanes stay inert.
    p = jnp.arange(HWp, dtype=jnp.int32)
    row = p // W
    col = p % W
    ms = []
    for dy in (-1, 0, 1):
        for dx in (-1, 0, 1):
            if dy == 0 and dx == 0:
                continue
            valid = ((row + dy >= 0) & (row + dy < H) &
                     (col + dx >= 0) & (col + dx < W) & (p < HW))
            ms.append(valid)
    mask = jnp.stack(ms, axis=0).astype(cd).reshape(8, 1, HWp)                # (8, 1, HWp)

    kernel = functools.partial(spectrum_kernel, W=W, HWp=HWp, Ce1=Ce1, nb=nb)

    # Per-step VMEM footprint (double-buffered in/out + resident weights/masks
    # + f32 temporaries), with headroom; capped below v7x physical VMEM.
    est = (2 * nb * Cin * HWp * cd.itemsize
           + 2 * nb * Ctot * HWp * jnp.dtype(out_dtype).itemsize
           + (Cp * Cin + Ctot * Cp + 8 * Ce3 * Cp + 8 * HWp) * cd.itemsize
           + (Cp + Ctot) * 4
           + (2 * Cp + Ctot + 2 * Ce3) * HWp * 4)
    vmem_limit = int(min(60 << 20, max(32 << 20, est + (2 << 20))))

    out = pl.pallas_call(
        kernel,
        out_shape=jax.ShapeDtypeStruct((N, Ctot, HWp), out_dtype),
        grid_spec=pltpu.PrefetchScalarGridSpec(
            num_scalar_prefetch=0,
            grid=(N // nb,),
            in_specs=[
                pl.BlockSpec((nb, Cin, HWp), lambda g: (g, 0, 0)),
                pl.BlockSpec((Cp, Cin), lambda g: (0, 0)),
                pl.BlockSpec((Cp, 1), lambda g: (0, 0)),
                pl.BlockSpec((Ctot, Cp), lambda g: (0, 0)),
                pl.BlockSpec((8, Ce3, Cp), lambda g: (0, 0, 0)),
                pl.BlockSpec((Ctot, 1), lambda g: (0, 0)),
                pl.BlockSpec((8, 1, HWp), lambda g: (0, 0, 0)),
            ],
            out_specs=pl.BlockSpec((nb, Ctot, HWp), lambda g: (g, 0, 0)),
        ),
        compiler_params=pltpu.CompilerParams(
            dimension_semantics=("parallel",),
            vmem_limit_bytes=vmem_limit),
    )(x, wsq_t, bsq_c, wc, wr, bo, mask)

    if HWp != HW:
        out = out[:, :, :HW]
    return out.reshape(N, Ctot, H, W)


def make_params(key, inplanes, squeeze_planes, expand1x1_planes, expand3x3_planes):
    """Deterministic synthetic parameters (shapes match nn.Conv2d weights)."""
    ks = jax.random.split(key, 6)
    wsq = jax.random.normal(ks[0], (inplanes, squeeze_planes), jnp.float32) * 0.3
    bsq = jax.random.normal(ks[1], (squeeze_planes,), jnp.float32) * 0.1
    we1 = jax.random.normal(ks[2], (squeeze_planes, expand1x1_planes), jnp.float32) * 0.3
    be1 = jax.random.normal(ks[3], (expand1x1_planes,), jnp.float32) * 0.1
    we3 = jax.random.normal(ks[4], (3, 3, squeeze_planes, expand3x3_planes), jnp.float32) * 0.3
    be3 = jax.random.normal(ks[5], (expand3x3_planes,), jnp.float32) * 0.1
    return wsq, bsq, we1, be1, we3, be3


def spectrum_reference(x_nchw, params):
    """Pure-JAX reference (same semantics as the PyTorch module)."""
    wsq, bsq, we1, be1, we3, be3 = params

    def conv(x, w_oihw, b, pad):
        y = lax.conv_general_dilated(
            x, w_oihw, window_strides=(1, 1),
            padding=((pad, pad), (pad, pad)),
            dimension_numbers=("NCHW", "OIHW", "NCHW"))
        return y + b[None, :, None, None]

    w_sq = jnp.transpose(wsq)[:, :, None, None]           # (Csq, Cin, 1, 1)
    w_e1 = jnp.transpose(we1)[:, :, None, None]           # (Ce1, Csq, 1, 1)
    w_e3 = jnp.transpose(we3, (3, 2, 0, 1))               # (Ce3, Csq, 3, 3)

    s = jax.nn.relu(conv(x_nchw, w_sq, bsq, 0))
    e1 = jax.nn.relu(conv(s, w_e1, be1, 0))
    e3 = jax.nn.relu(conv(s, w_e3, be3, 1))
    return jnp.concatenate([e1, e3], axis=1)


if __name__ == "__main__":
    key = jax.random.PRNGKey(0)
    kx, kp, kx2 = jax.random.split(key, 3)

    # Config 1: HW = 256 (already a 128 multiple), batch block covers N.
    N, Cin, H, W = 2, 4, 16, 16
    squeeze_planes, expand1x1_planes, expand3x3_planes = 4, 8, 8
    x = jax.random.normal(kx, (N, Cin, H, W), jnp.float32)
    params = make_params(kp, Cin, squeeze_planes, expand1x1_planes, expand3x3_planes)
    ref = jax.block_until_ready(spectrum_reference(x, params))

    # f32 MXU path: matches the f32 conv reference.
    out = jax.block_until_ready(spectrum_forward(x, params))
    assert out.shape == (N, expand1x1_planes + expand3x3_planes, H, W), out.shape
    assert jnp.allclose(out, ref, atol=1e-4, rtol=1e-4), \
        float(jnp.max(jnp.abs(out - ref)))

    # bf16 MXU-operand path (bf16 HBM activations, f32 accumulation/epilogue).
    out_bf16 = jax.block_until_ready(
        spectrum_forward(x, params, compute_dtype=jnp.bfloat16))
    assert jnp.allclose(out_bf16, ref, atol=2e-1, rtol=5e-2), \
        float(jnp.max(jnp.abs(out_bf16 - ref)))

    # Config 2: non-128-multiple spatial extent (HW = 169 -> padded to 256)
    # exercises the lane-padding / mask path.
    H2, W2 = 13, 13
    x2 = jax.random.normal(kx2, (N, Cin, H2, W2), jnp.float32)
    ref2 = jax.block_until_ready(spectrum_reference(x2, params))
    out2 = jax.block_until_ready(spectrum_forward(x2, params))
    assert out2.shape == (N, expand1x1_planes + expand3x3_planes, H2, W2), out2.shape
    assert jnp.allclose(out2, ref2, atol=1e-4, rtol=1e-4), \
        float(jnp.max(jnp.abs(out2 - ref2)))

    print("KERNEL_OK")
</pallas_src>

<mosaic_0001>
module attributes {stable_mosaic.version = 11 : i64} {
  func.func @spectrum_kernel(%arg0: i32, %arg1: memref<2x4x256xf32, #tpu.memory_space<vmem>>, %arg2: memref<8x4xf32, #tpu.memory_space<vmem>>, %arg3: memref<8x1xf32, #tpu.memory_space<vmem>>, %arg4: memref<16x8xf32, #tpu.memory_space<vmem>>, %arg5: memref<8x8x8xf32, #tpu.memory_space<vmem>>, %arg6: memref<16x1xf32, #tpu.memory_space<vmem>>, %arg7: memref<8x1x256xf32, #tpu.memory_space<vmem>>, %arg8: memref<2x16x256xf32, #tpu.memory_space<vmem>>) attributes {dimension_semantics = [#tpu.dimension_semantics<parallel>], iteration_bounds = array<i64: 1>, scalar_prefetch = 0 : i64, scratch_operands = 0 : i64, tpu.core_type = #tpu.core_type<tc>, window_params = [{transform_indices = @transform_0, window_bounds = array<i64: 2, 4, 256>}, {pipeline_mode = #tpu.pipeline_mode<synchronous>, transform_indices = @transform_1, window_bounds = array<i64: 8, 4>}, {pipeline_mode = #tpu.pipeline_mode<synchronous>, transform_indices = @transform_2, window_bounds = array<i64: 8, 1>}, {pipeline_mode = #tpu.pipeline_mode<synchronous>, transform_indices = @transform_3, window_bounds = array<i64: 16, 8>}, {pipeline_mode = #tpu.pipeline_mode<synchronous>, transform_indices = @transform_4, window_bounds = array<i64: 8, 8, 8>}, {pipeline_mode = #tpu.pipeline_mode<synchronous>, transform_indices = @transform_5, window_bounds = array<i64: 16, 1>}, {pipeline_mode = #tpu.pipeline_mode<synchronous>, transform_indices = @transform_6, window_bounds = array<i64: 8, 1, 256>}, {transform_indices = @transform_7, window_bounds = array<i64: 2, 16, 256>}]} {
    %c0 = arith.constant 0 : index
    %c0_0 = arith.constant 0 : index
    %0 = vector.load %arg2[%c0, %c0_0] : memref<8x4xf32, #tpu.memory_space<vmem>>, vector<8x4xf32>
    %c0_1 = arith.constant 0 : index
    %c0_2 = arith.constant 0 : index
    %1 = vector.load %arg4[%c0_1, %c0_2] : memref<16x8xf32, #tpu.memory_space<vmem>>, vector<16x8xf32>
    %c0_3 = arith.constant 0 : index
    %c0_4 = arith.constant 0 : index
    %2 = vector.load %arg3[%c0_3, %c0_4] : memref<8x1xf32, #tpu.memory_space<vmem>>, vector<8x1xf32>
    %c0_5 = arith.constant 0 : index
    %c0_6 = arith.constant 0 : index
    %3 = vector.load %arg6[%c0_5, %c0_6] : memref<16x1xf32, #tpu.memory_space<vmem>>, vector<16x1xf32>
    %c0_7 = arith.constant 0 : index
    %c0_8 = arith.constant 0 : index
    %c0_9 = arith.constant 0 : index
    %4 = vector.load %arg1[%c0_7, %c0_8, %c0_9] : memref<2x4x256xf32, #tpu.memory_space<vmem>>, vector<1x4x256xf32>
    %5 = vector.shape_cast %4 : vector<1x4x256xf32> to vector<4x256xf32>
    %cst = arith.constant dense<0.000000e+00> : vector<8x256xf32>
    %6 = tpu.matmul %0, %5, %cst {dimension_numbers = #tpu.dot_dimension_numbers<[1], [0], [0], [1], [0, 0, 1, 1], [], []>} : vector<8x4xf32>, vector<4x256xf32>, vector<8x256xf32> -> vector<8x256xf32>
    %7 = vector.broadcast %2 : vector<8x1xf32> to vector<8x256xf32>
    %8 = arith.addf %6, %7 : vector<8x256xf32>
    %cst_10 = arith.constant 0.000000e+00 : f32
    %9 = vector.broadcast %cst_10 : f32 to vector<8x256xf32>
    %10 = arith.maximumf %8, %9 : vector<8x256xf32>
    %cst_11 = arith.constant dense<0.000000e+00> : vector<16x256xf32>
    %11 = tpu.matmul %1, %10, %cst_11 {dimension_numbers = #tpu.dot_dimension_numbers<[1], [0], [0], [1], [0, 0, 1, 1], [], []>} : vector<16x8xf32>, vector<8x256xf32>, vector<16x256xf32> -> vector<16x256xf32>
    %12 = vector.extract_strided_slice %11 {offsets = [8, 0], sizes = [8, 256], strides = [1, 1]} : vector<16x256xf32> to vector<8x256xf32>
    %13 = vector.extract_strided_slice %3 {offsets = [8, 0], sizes = [8, 1], strides = [1, 1]} : vector<16x1xf32> to vector<8x1xf32>
    %14 = vector.broadcast %13 : vector<8x1xf32> to vector<8x256xf32>
    %15 = arith.addf %12, %14 : vector<8x256xf32>
    %c17_i32 = arith.constant 17 : i32
    %16 = tpu.dynamic_rotate %10 by %c17_i32 dim 1 : vector<8x256xf32>, i32 -> vector<8x256xf32>
    %c0_12 = arith.constant 0 : index
    %c0_13 = arith.constant 0 : index
    %c0_14 = arith.constant 0 : index
    %17 = vector.load %arg7[%c0_12, %c0_13, %c0_14] : memref<8x1x256xf32, #tpu.memory_space<vmem>>, vector<1x1x256xf32>
    %18 = vector.shape_cast %17 : vector<1x1x256xf32> to vector<1x256xf32>
    %19 = vector.broadcast %18 : vector<1x256xf32> to vector<8x256xf32>
    %20 = arith.mulf %16, %19 : vector<8x256xf32>
    %c0_15 = arith.constant 0 : index
    %c0_16 = arith.constant 0 : index
    %c0_17 = arith.constant 0 : index
    %21 = vector.load %arg5[%c0_15, %c0_16, %c0_17] : memref<8x8x8xf32, #tpu.memory_space<vmem>>, vector<1x8x8xf32>
    %22 = vector.shape_cast %21 : vector<1x8x8xf32> to vector<8x8xf32>
    %cst_18 = arith.constant dense<0.000000e+00> : vector<8x256xf32>
    %23 = tpu.matmul %22, %20, %cst_18 {dimension_numbers = #tpu.dot_dimension_numbers<[1], [0], [0], [1], [0, 0, 1, 1], [], []>} : vector<8x8xf32>, vector<8x256xf32>, vector<8x256xf32> -> vector<8x256xf32>
    %24 = arith.addf %15, %23 : vector<8x256xf32>
    %c16_i32 = arith.constant 16 : i32
    %25 = tpu.dynamic_rotate %10 by %c16_i32 dim 1 : vector<8x256xf32>, i32 -> vector<8x256xf32>
    %c1 = arith.constant 1 : index
    %c0_19 = arith.constant 0 : index
    %c0_20 = arith.constant 0 : index
    %26 = vector.load %arg7[%c1, %c0_19, %c0_20] : memref<8x1x256xf32, #tpu.memory_space<vmem>>, vector<1x1x256xf32>
    %27 = vector.shape_cast %26 : vector<1x1x256xf32> to vector<1x256xf32>
    %28 = vector.broadcast %27 : vector<1x256xf32> to vector<8x256xf32>
    %29 = arith.mulf %25, %28 : vector<8x256xf32>
    %c1_21 = arith.constant 1 : index
    %c0_22 = arith.constant 0 : index
    %c0_23 = arith.constant 0 : index
    %30 = vector.load %arg5[%c1_21, %c0_22, %c0_23] : memref<8x8x8xf32, #tpu.memory_space<vmem>>, vector<1x8x8xf32>
    %31 = vector.shape_cast %30 : vector<1x8x8xf32> to vector<8x8xf32>
    %cst_24 = arith.constant dense<0.000000e+00> : vector<8x256xf32>
    %32 = tpu.matmul %31, %29, %cst_24 {dimension_numbers = #tpu.dot_dimension_numbers<[1], [0], [0], [1], [0, 0, 1, 1], [], []>} : vector<8x8xf32>, vector<8x256xf32>, vector<8x256xf32> -> vector<8x256xf32>
    %33 = arith.addf %24, %32 : vector<8x256xf32>
    %c15_i32 = arith.constant 15 : i32
    %34 = tpu.dynamic_rotate %10 by %c15_i32 dim 1 : vector<8x256xf32>, i32 -> vector<8x256xf32>
    %c2 = arith.constant 2 : index
    %c0_25 = arith.constant 0 : index
    %c0_26 = arith.constant 0 : index
    %35 = vector.load %arg7[%c2, %c0_25, %c0_26] : memref<8x1x256xf32, #tpu.memory_space<vmem>>, vector<1x1x256xf32>
    %36 = vector.shape_cast %35 : vector<1x1x256xf32> to vector<1x256xf32>
    %37 = vector.broadcast %36 : vector<1x256xf32> to vector<8x256xf32>
    %38 = arith.mulf %34, %37 : vector<8x256xf32>
    %c2_27 = arith.constant 2 : index
    %c0_28 = arith.constant 0 : index
    %c0_29 = arith.constant 0 : index
    %39 = vector.load %arg5[%c2_27, %c0_28, %c0_29] : memref<8x8x8xf32, #tpu.memory_space<vmem>>, vector<1x8x8xf32>
    %40 = vector.shape_cast %39 : vector<1x8x8xf32> to vector<8x8xf32>
    %cst_30 = arith.constant dense<0.000000e+00> : vector<8x256xf32>
    %41 = tpu.matmul %40, %38, %cst_30 {dimension_numbers = #tpu.dot_dimension_numbers<[1], [0], [0], [1], [0, 0, 1, 1], [], []>} : vector<8x8xf32>, vector<8x256xf32>, vector<8x256xf32> -> vector<8x256xf32>
    %42 = arith.addf %33, %41 : vector<8x256xf32>
    %c1_i32 = arith.constant 1 : i32
    %43 = tpu.dynamic_rotate %10 by %c1_i32 dim 1 : vector<8x256xf32>, i32 -> vector<8x256xf32>
    %c3 = arith.constant 3 : index
    %c0_31 = arith.constant 0 : index
    %c0_32 = arith.constant 0 : index
    %44 = vector.load %arg7[%c3, %c0_31, %c0_32] : memref<8x1x256xf32, #tpu.memory_space<vmem>>, vector<1x1x256xf32>
    %45 = vector.shape_cast %44 : vector<1x1x256xf32> to vector<1x256xf32>
    %46 = vector.broadcast %45 : vector<1x256xf32> to vector<8x256xf32>
    %47 = arith.mulf %43, %46 : vector<8x256xf32>
    %c3_33 = arith.constant 3 : index
    %c0_34 = arith.constant 0 : index
    %c0_35 = arith.constant 0 : index
    %48 = vector.load %arg5[%c3_33, %c0_34, %c0_35] : memref<8x8x8xf32, #tpu.memory_space<vmem>>, vector<1x8x8xf32>
    %49 = vector.shape_cast %48 : vector<1x8x8xf32> to vector<8x8xf32>
    %cst_36 = arith.constant dense<0.000000e+00> : vector<8x256xf32>
    %50 = tpu.matmul %49, %47, %cst_36 {dimension_numbers = #tpu.dot_dimension_numbers<[1], [0], [0], [1], [0, 0, 1, 1], [], []>} : vector<8x8xf32>, vector<8x256xf32>, vector<8x256xf32> -> vector<8x256xf32>
    %51 = arith.addf %42, %50 : vector<8x256xf32>
    %c255_i32 = arith.constant 255 : i32
    %52 = tpu.dynamic_rotate %10 by %c255_i32 dim 1 : vector<8x256xf32>, i32 -> vector<8x256xf32>
    %c4 = arith.constant 4 : index
    %c0_37 = arith.constant 0 : index
    %c0_38 = arith.constant 0 : index
    %53 = vector.load %arg7[%c4, %c0_37, %c0_38] : memref<8x1x256xf32, #tpu.memory_space<vmem>>, vector<1x1x256xf32>
    %54 = vector.shape_cast %53 : vector<1x1x256xf32> to vector<1x256xf32>
    %55 = vector.broadcast %54 : vector<1x256xf32> to vector<8x256xf32>
    %56 = arith.mulf %52, %55 : vector<8x256xf32>
    %c4_39 = arith.constant 4 : index
    %c0_40 = arith.constant 0 : index
    %c0_41 = arith.constant 0 : index
    %57 = vector.load %arg5[%c4_39, %c0_40, %c0_41] : memref<8x8x8xf32, #tpu.memory_space<vmem>>, vector<1x8x8xf32>
    %58 = vector.shape_cast %57 : vector<1x8x8xf32> to vector<8x8xf32>
    %cst_42 = arith.constant dense<0.000000e+00> : vector<8x256xf32>
    %59 = tpu.matmul %58, %56, %cst_42 {dimension_numbers = #tpu.dot_dimension_numbers<[1], [0], [0], [1], [0, 0, 1, 1], [], []>} : vector<8x8xf32>, vector<8x256xf32>, vector<8x256xf32> -> vector<8x256xf32>
    %60 = arith.addf %51, %59 : vector<8x256xf32>
    %c241_i32 = arith.constant 241 : i32
    %61 = tpu.dynamic_rotate %10 by %c241_i32 dim 1 : vector<8x256xf32>, i32 -> vector<8x256xf32>
    %c5 = arith.constant 5 : index
    %c0_43 = arith.constant 0 : index
    %c0_44 = arith.constant 0 : index
    %62 = vector.load %arg7[%c5, %c0_43, %c0_44] : memref<8x1x256xf32, #tpu.memory_space<vmem>>, vector<1x1x256xf32>
    %63 = vector.shape_cast %62 : vector<1x1x256xf32> to vector<1x256xf32>
    %64 = vector.broadcast %63 : vector<1x256xf32> to vector<8x256xf32>
    %65 = arith.mulf %61, %64 : vector<8x256xf32>
    %c5_45 = arith.constant 5 : index
    %c0_46 = arith.constant 0 : index
    %c0_47 = arith.constant 0 : index
    %66 = vector.load %arg5[%c5_45, %c0_46, %c0_47] : memref<8x8x8xf32, #tpu.memory_space<vmem>>, vector<1x8x8xf32>
    %67 = vector.shape_cast %66 : vector<1x8x8xf32> to vector<8x8xf32>
    %cst_48 = arith.constant dense<0.000000e+00> : vector<8x256xf32>
    %68 = tpu.matmul %67, %65, %cst_48 {dimension_numbers = #tpu.dot_dimension_numbers<[1], [0], [0], [1], [0, 0, 1, 1], [], []>} : vector<8x8xf32>, vector<8x256xf32>, vector<8x256xf32> -> vector<8x256xf32>
    %69 = arith.addf %60, %68 : vector<8x256xf32>
    %c240_i32 = arith.constant 240 : i32
    %70 = tpu.dynamic_rotate %10 by %c240_i32 dim 1 : vector<8x256xf32>, i32 -> vector<8x256xf32>
    %c6 = arith.constant 6 : index
    %c0_49 = arith.constant 0 : index
    %c0_50 = arith.constant 0 : index
    %71 = vector.load %arg7[%c6, %c0_49, %c0_50] : memref<8x1x256xf32, #tpu.memory_space<vmem>>, vector<1x1x256xf32>
    %72 = vector.shape_cast %71 : vector<1x1x256xf32> to vector<1x256xf32>
    %73 = vector.broadcast %72 : vector<1x256xf32> to vector<8x256xf32>
    %74 = arith.mulf %70, %73 : vector<8x256xf32>
    %c6_51 = arith.constant 6 : index
    %c0_52 = arith.constant 0 : index
    %c0_53 = arith.constant 0 : index
    %75 = vector.load %arg5[%c6_51, %c0_52, %c0_53] : memref<8x8x8xf32, #tpu.memory_space<vmem>>, vector<1x8x8xf32>
    %76 = vector.shape_cast %75 : vector<1x8x8xf32> to vector<8x8xf32>
    %cst_54 = arith.constant dense<0.000000e+00> : vector<8x256xf32>
    %77 = tpu.matmul %76, %74, %cst_54 {dimension_numbers = #tpu.dot_dimension_numbers<[1], [0], [0], [1], [0, 0, 1, 1], [], []>} : vector<8x8xf32>, vector<8x256xf32>, vector<8x256xf32> -> vector<8x256xf32>
    %78 = arith.addf %69, %77 : vector<8x256xf32>
    %c239_i32 = arith.constant 239 : i32
    %79 = tpu.dynamic_rotate %10 by %c239_i32 dim 1 : vector<8x256xf32>, i32 -> vector<8x256xf32>
    %c7 = arith.constant 7 : index
    %c0_55 = arith.constant 0 : index
    %c0_56 = arith.constant 0 : index
    %80 = vector.load %arg7[%c7, %c0_55, %c0_56] : memref<8x1x256xf32, #tpu.memory_space<vmem>>, vector<1x1x256xf32>
    %81 = vector.shape_cast %80 : vector<1x1x256xf32> to vector<1x256xf32>
    %82 = vector.broadcast %81 : vector<1x256xf32> to vector<8x256xf32>
    %83 = arith.mulf %79, %82 : vector<8x256xf32>
    %c7_57 = arith.constant 7 : index
    %c0_58 = arith.constant 0 : index
    %c0_59 = arith.constant 0 : index
    %84 = vector.load %arg5[%c7_57, %c0_58, %c0_59] : memref<8x8x8xf32, #tpu.memory_space<vmem>>, vector<1x8x8xf32>
    %85 = vector.shape_cast %84 : vector<1x8x8xf32> to vector<8x8xf32>
    %cst_60 = arith.constant dense<0.000000e+00> : vector<8x256xf32>
    %86 = tpu.matmul %85, %83, %cst_60 {dimension_numbers = #tpu.dot_dimension_numbers<[1], [0], [0], [1], [0, 0, 1, 1], [], []>} : vector<8x8xf32>, vector<8x256xf32>, vector<8x256xf32> -> vector<8x256xf32>
    %87 = arith.addf %78, %86 : vector<8x256xf32>
    %88 = vector.extract_strided_slice %11 {offsets = [0, 0], sizes = [8, 256], strides = [1, 1]} : vector<16x256xf32> to vector<8x256xf32>
    %89 = vector.extract_strided_slice %3 {offsets = [0, 0], sizes = [8, 1], strides = [1, 1]} : vector<16x1xf32> to vector<8x1xf32>
    %90 = vector.broadcast %89 : vector<8x1xf32> to vector<8x256xf32>
    %91 = arith.addf %88, %90 : vector<8x256xf32>
    %cst_61 = arith.constant 0.000000e+00 : f32
    %92 = vector.broadcast %cst_61 : f32 to vector<8x256xf32>
    %93 = arith.maximumf %91, %92 : vector<8x256xf32>
    %cst_62 = arith.constant 0.000000e+00 : f32
    %94 = vector.broadcast %cst_62 : f32 to vector<8x256xf32>
    %95 = arith.maximumf %87, %94 : vector<8x256xf32>
    %96 = tpu.concatenate %93, %95 in 0 : vector<8x256xf32>, vector<8x256xf32> -> vector<16x256xf32>
    %c0_63 = arith.constant 0 : index
    %c0_64 = arith.constant 0 : index
    %c0_65 = arith.constant 0 : index
    %97 = vector.load %arg8[%c0_63, %c0_64, %c0_65] : memref<2x16x256xf32, #tpu.memory_space<vmem>>, vector<1x16x256xf32>
    %98 = vector.shape_cast %97 : vector<1x16x256xf32> to vector<16x256xf32>
    %99 = vector.shape_cast %96 : vector<16x256xf32> to vector<1x16x256xf32>
    tpu.vector_store %arg8[%c0_63, %c0_64, %c0_65], %99 {strides = array<i32>} : memref<2x16x256xf32, #tpu.memory_space<vmem>>, vector<1x16x256xf32>,
    %c1_66 = arith.constant 1 : index
    %c0_67 = arith.constant 0 : index
    %c0_68 = arith.constant 0 : index
    %100 = vector.load %arg1[%c1_66, %c0_67, %c0_68] : memref<2x4x256xf32, #tpu.memory_space<vmem>>, vector<1x4x256xf32>
    %101 = vector.shape_cast %100 : vector<1x4x256xf32> to vector<4x256xf32>
    %cst_69 = arith.constant dense<0.000000e+00> : vector<8x256xf32>
    %102 = tpu.matmul %0, %101, %cst_69 {dimension_numbers = #tpu.dot_dimension_numbers<[1], [0], [0], [1], [0, 0, 1, 1], [], []>} : vector<8x4xf32>, vector<4x256xf32>, vector<8x256xf32> -> vector<8x256xf32>
    %103 = vector.broadcast %2 : vector<8x1xf32> to vector<8x256xf32>
    %104 = arith.addf %102, %103 : vector<8x256xf32>
    %cst_70 = arith.constant 0.000000e+00 : f32
    %105 = vector.broadcast %cst_70 : f32 to vector<8x256xf32>
    %106 = arith.maximumf %104, %105 : vector<8x256xf32>
    %cst_71 = arith.constant dense<0.000000e+00> : vector<16x256xf32>
    %107 = tpu.matmul %1, %106, %cst_71 {dimension_numbers = #tpu.dot_dimension_numbers<[1], [0], [0], [1], [0, 0, 1, 1], [], []>} : vector<16x8xf32>, vector<8x256xf32>, vector<16x256xf32> -> vector<16x256xf32>
    %108 = vector.extract_strided_slice %107 {offsets = [8, 0], sizes = [8, 256], strides = [1, 1]} : vector<16x256xf32> to vector<8x256xf32>
    %109 = vector.extract_strided_slice %3 {offsets = [8, 0], sizes = [8, 1], strides = [1, 1]} : vector<16x1xf32> to vector<8x1xf32>
    %110 = vector.broadcast %109 : vector<8x1xf32> to vector<8x256xf32>
    %111 = arith.addf %108, %110 : vector<8x256xf32>
    %c17_i32_72 = arith.constant 17 : i32
    %112 = tpu.dynamic_rotate %106 by %c17_i32_72 dim 1 : vector<8x256xf32>, i32 -> vector<8x256xf32>
    %c0_73 = arith.constant 0 : index
    %c0_74 = arith.constant 0 : index
    %c0_75 = arith.constant 0 : index
    %113 = vector.load %arg7[%c0_73, %c0_74, %c0_75] : memref<8x1x256xf32, #tpu.memory_space<vmem>>, vector<1x1x256xf32>
    %114 = vector.shape_cast %113 : vector<1x1x256xf32> to vector<1x256xf32>
    %115 = vector.broadcast %114 : vector<1x256xf32> to vector<8x256xf32>
    %116 = arith.mulf %112, %115 : vector<8x256xf32>
    %c0_76 = arith.constant 0 : index
    %c0_77 = arith.constant 0 : index
    %c0_78 = arith.constant 0 : index
    %117 = vector.load %arg5[%c0_76, %c0_77, %c0_78] : memref<8x8x8xf32, #tpu.memory_space<vmem>>, vector<1x8x8xf32>
    %118 = vector.shape_cast %117 : vector<1x8x8xf32> to vector<8x8xf32>
    %cst_79 = arith.constant dense<0.000000e+00> : vector<8x256xf32>
    %119 = tpu.matmul %118, %116, %cst_79 {dimension_numbers = #tpu.dot_dimension_numbers<[1], [0], [0], [1], [0, 0, 1, 1], [], []>} : vector<8x8xf32>, vector<8x256xf32>, vector<8x256xf32> -> vector<8x256xf32>
    %120 = arith.addf %111, %119 : vector<8x256xf32>
    %c16_i32_80 = arith.constant 16 : i32
    %121 = tpu.dynamic_rotate %106 by %c16_i32_80 dim 1 : vector<8x256xf32>, i32 -> vector<8x256xf32>
    %c1_81 = arith.constant 1 : index
    %c0_82 = arith.constant 0 : index
    %c0_83 = arith.constant 0 : index
    %122 = vector.load %arg7[%c1_81, %c0_82, %c0_83] : memref<8x1x256xf32, #tpu.memory_space<vmem>>, vector<1x1x256xf32>
    %123 = vector.shape_cast %122 : vector<1x1x256xf32> to vector<1x256xf32>
    %124 = vector.broadcast %123 : vector<1x256xf32> to vector<8x256xf32>
    %125 = arith.mulf %121, %124 : vector<8x256xf32>
    %c1_84 = arith.constant 1 : index
    %c0_85 = arith.constant 0 : index
    %c0_86 = arith.constant 0 : index
    %126 = vector.load %arg5[%c1_84, %c0_85, %c0_86] : memref<8x8x8xf32, #tpu.memory_space<vmem>>, vector<1x8x8xf32>
    %127 = vector.shape_cast %126 : vector<1x8x8xf32> to vector<8x8xf32>
    %cst_87 = arith.constant dense<0.000000e+00> : vector<8x256xf32>
    %128 = tpu.matmul %127, %125, %cst_87 {dimension_numbers = #tpu.dot_dimension_numbers<[1], [0], [0], [1], [0, 0, 1, 1], [], []>} : vector<8x8xf32>, vector<8x256xf32>, vector<8x256xf32> -> vector<8x256xf32>
    %129 = arith.addf %120, %128 : vector<8x256xf32>
    %c15_i32_88 = arith.constant 15 : i32
    %130 = tpu.dynamic_rotate %106 by %c15_i32_88 dim 1 : vector<8x256xf32>, i32 -> vector<8x256xf32>
    %c2_89 = arith.constant 2 : index
    %c0_90 = arith.constant 0 : index
    %c0_91 = arith.constant 0 : index
    %131 = vector.load %arg7[%c2_89, %c0_90, %c0_91] : memref<8x1x256xf32, #tpu.memory_space<vmem>>, vector<1x1x256xf32>
    %132 = vector.shape_cast %131 : vector<1x1x256xf32> to vector<1x256xf32>
    %133 = vector.broadcast %132 : vector<1x256xf32> to vector<8x256xf32>
    %134 = arith.mulf %130, %133 : vector<8x256xf32>
    %c2_92 = arith.constant 2 : index
    %c0_93 = arith.constant 0 : index
    %c0_94 = arith.constant 0 : index
    %135 = vector.load %arg5[%c2_92, %c0_93, %c0_94] : memref<8x8x8xf32, #tpu.memory_space<vmem>>, vector<1x8x8xf32>
    %136 = vector.shape_cast %135 : vector<1x8x8xf32> to vector<8x8xf32>
    %cst_95 = arith.constant dense<0.000000e+00> : vector<8x256xf32>
    %137 = tpu.matmul %136, %134, %cst_95 {dimension_numbers = #tpu.dot_dimension_numbers<[1], [0], [0], [1], [0, 0, 1, 1], [], []>} : vector<8x8xf32>, vector<8x256xf32>, vector<8x256xf32> -> vector<8x256xf32>
    %138 = arith.addf %129, %137 : vector<8x256xf32>
    %c1_i32_96 = arith.constant 1 : i32
    %139 = tpu.dynamic_rotate %106 by %c1_i32_96 dim 1 : vector<8x256xf32>, i32 -> vector<8x256xf32>
    %c3_97 = arith.constant 3 : index
    %c0_98 = arith.constant 0 : index
    %c0_99 = arith.constant 0 : index
    %140 = vector.load %arg7[%c3_97, %c0_98, %c0_99] : memref<8x1x256xf32, #tpu.memory_space<vmem>>, vector<1x1x256xf32>
    %141 = vector.shape_cast %140 : vector<1x1x256xf32> to vector<1x256xf32>
    %142 = vector.broadcast %141 : vector<1x256xf32> to vector<8x256xf32>
    %143 = arith.mulf %139, %142 : vector<8x256xf32>
    %c3_100 = arith.constant 3 : index
    %c0_101 = arith.constant 0 : index
    %c0_102 = arith.constant 0 : index
    %144 = vector.load %arg5[%c3_100, %c0_101, %c0_102] : memref<8x8x8xf32, #tpu.memory_space<vmem>>, vector<1x8x8xf32>
    %145 = vector.shape_cast %144 : vector<1x8x8xf32> to vector<8x8xf32>
    %cst_103 = arith.constant dense<0.000000e+00> : vector<8x256xf32>
    %146 = tpu.matmul %145, %143, %cst_103 {dimension_numbers = #tpu.dot_dimension_numbers<[1], [0], [0], [1], [0, 0, 1, 1], [], []>} : vector<8x8xf32>, vector<8x256xf32>, vector<8x256xf32> -> vector<8x256xf32>
    %147 = arith.addf %138, %146 : vector<8x256xf32>
    %c255_i32_104 = arith.constant 255 : i32
    %148 = tpu.dynamic_rotate %106 by %c255_i32_104 dim 1 : vector<8x256xf32>, i32 -> vector<8x256xf32>
    %c4_105 = arith.constant 4 : index
    %c0_106 = arith.constant 0 : index
    %c0_107 = arith.constant 0 : index
    %149 = vector.load %arg7[%c4_105, %c0_106, %c0_107] : memref<8x1x256xf32, #tpu.memory_space<vmem>>, vector<1x1x256xf32>
    %150 = vector.shape_cast %149 : vector<1x1x256xf32> to vector<1x256xf32>
    %151 = vector.broadcast %150 : vector<1x256xf32> to vector<8x256xf32>
    %152 = arith.mulf %148, %151 : vector<8x256xf32>
    %c4_108 = arith.constant 4 : index
    %c0_109 = arith.constant 0 : index
    %c0_110 = arith.constant 0 : index
    %153 = vector.load %arg5[%c4_108, %c0_109, %c0_110] : memref<8x8x8xf32, #tpu.memory_space<vmem>>, vector<1x8x8xf32>
    %154 = vector.shape_cast %153 : vector<1x8x8xf32> to vector<8x8xf32>
    %cst_111 = arith.constant dense<0.000000e+00> : vector<8x256xf32>
    %155 = tpu.matmul %154, %152, %cst_111 {dimension_numbers = #tpu.dot_dimension_numbers<[1], [0], [0], [1], [0, 0, 1, 1], [], []>} : vector<8x8xf32>, vector<8x256xf32>, vector<8x256xf32> -> vector<8x256xf32>
    %156 = arith.addf %147, %155 : vector<8x256xf32>
    %c241_i32_112 = arith.constant 241 : i32
    %157 = tpu.dynamic_rotate %106 by %c241_i32_112 dim 1 : vector<8x256xf32>, i32 -> vector<8x256xf32>
    %c5_113 = arith.constant 5 : index
    %c0_114 = arith.constant 0 : index
    %c0_115 = arith.constant 0 : index
    %158 = vector.load %arg7[%c5_113, %c0_114, %c0_115] : memref<8x1x256xf32, #tpu.memory_space<vmem>>, vector<1x1x256xf32>
    %159 = vector.shape_cast %158 : vector<1x1x256xf32> to vector<1x256xf32>
    %160 = vector.broadcast %159 : vector<1x256xf32> to vector<8x256xf32>
    %161 = arith.mulf %157, %160 : vector<8x256xf32>
    %c5_116 = arith.constant 5 : index
    %c0_117 = arith.constant 0 : index
    %c0_118 = arith.constant 0 : index
    %162 = vector.load %arg5[%c5_116, %c0_117, %c0_118] : memref<8x8x8xf32, #tpu.memory_space<vmem>>, vector<1x8x8xf32>
    %163 = vector.shape_cast %162 : vector<1x8x8xf32> to vector<8x8xf32>
    %cst_119 = arith.constant dense<0.000000e+00> : vector<8x256xf32>
    %164 = tpu.matmul %163, %161, %cst_119 {dimension_numbers = #tpu.dot_dimension_numbers<[1], [0], [0], [1], [0, 0, 1, 1], [], []>} : vector<8x8xf32>, vector<8x256xf32>, vector<8x256xf32> -> vector<8x256xf32>
    %165 = arith.addf %156, %164 : vector<8x256xf32>
    %c240_i32_120 = arith.constant 240 : i32
    %166 = tpu.dynamic_rotate %106 by %c240_i32_120 dim 1 : vector<8x256xf32>, i32 -> vector<8x256xf32>
    %c6_121 = arith.constant 6 : index
    %c0_122 = arith.constant 0 : index
    %c0_123 = arith.constant 0 : index
    %167 = vector.load %arg7[%c6_121, %c0_122, %c0_123] : memref<8x1x256xf32, #tpu.memory_space<vmem>>, vector<1x1x256xf32>
    %168 = vector.shape_cast %167 : vector<1x1x256xf32> to vector<1x256xf32>
    %169 = vector.broadcast %168 : vector<1x256xf32> to vector<8x256xf32>
    %170 = arith.mulf %166, %169 : vector<8x256xf32>
    %c6_124 = arith.constant 6 : index
    %c0_125 = arith.constant 0 : index
    %c0_126 = arith.constant 0 : index
    %171 = vector.load %arg5[%c6_124, %c0_125, %c0_126] : memref<8x8x8xf32, #tpu.memory_space<vmem>>, vector<1x8x8xf32>
    %172 = vector.shape_cast %171 : vector<1x8x8xf32> to vector<8x8xf32>
    %cst_127 = arith.constant dense<0.000000e+00> : vector<8x256xf32>
    %173 = tpu.matmul %172, %170, %cst_127 {dimension_numbers = #tpu.dot_dimension_numbers<[1], [0], [0], [1], [0, 0, 1, 1], [], []>} : vector<8x8xf32>, vector<8x256xf32>, vector<8x256xf32> -> vector<8x256xf32>
    %174 = arith.addf %165, %173 : vector<8x256xf32>
    %c239_i32_128 = arith.constant 239 : i32
    %175 = tpu.dynamic_rotate %106 by %c239_i32_128 dim 1 : vector<8x256xf32>, i32 -> vector<8x256xf32>
    %c7_129 = arith.constant 7 : index
    %c0_130 = arith.constant 0 : index
    %c0_131 = arith.constant 0 : index
    %176 = vector.load %arg7[%c7_129, %c0_130, %c0_131] : memref<8x1x256xf32, #tpu.memory_space<vmem>>, vector<1x1x256xf32>
    %177 = vector.shape_cast %176 : vector<1x1x256xf32> to vector<1x256xf32>
    %178 = vector.broadcast %177 : vector<1x256xf32> to vector<8x256xf32>
    %179 = arith.mulf %175, %178 : vector<8x256xf32>
    %c7_132 = arith.constant 7 : index
    %c0_133 = arith.constant 0 : index
    %c0_134 = arith.constant 0 : index
    %180 = vector.load %arg5[%c7_132, %c0_133, %c0_134] : memref<8x8x8xf32, #tpu.memory_space<vmem>>, vector<1x8x8xf32>
    %181 = vector.shape_cast %180 : vector<1x8x8xf32> to vector<8x8xf32>
    %cst_135 = arith.constant dense<0.000000e+00> : vector<8x256xf32>
    %182 = tpu.matmul %181, %179, %cst_135 {dimension_numbers = #tpu.dot_dimension_numbers<[1], [0], [0], [1], [0, 0, 1, 1], [], []>} : vector<8x8xf32>, vector<8x256xf32>, vector<8x256xf32> -> vector<8x256xf32>
    %183 = arith.addf %174, %182 : vector<8x256xf32>
    %184 = vector.extract_strided_slice %107 {offsets = [0, 0], sizes = [8, 256], strides = [1, 1]} : vector<16x256xf32> to vector<8x256xf32>
    %185 = vector.extract_strided_slice %3 {offsets = [0, 0], sizes = [8, 1], strides = [1, 1]} : vector<16x1xf32> to vector<8x1xf32>
    %186 = vector.broadcast %185 : vector<8x1xf32> to vector<8x256xf32>
    %187 = arith.addf %184, %186 : vector<8x256xf32>
    %cst_136 = arith.constant 0.000000e+00 : f32
    %188 = vector.broadcast %cst_136 : f32 to vector<8x256xf32>
    %189 = arith.maximumf %187, %188 : vector<8x256xf32>
    %cst_137 = arith.constant 0.000000e+00 : f32
    %190 = vector.broadcast %cst_137 : f32 to vector<8x256xf32>
    %191 = arith.maximumf %183, %190 : vector<8x256xf32>
    %192 = tpu.concatenate %189, %191 in 0 : vector<8x256xf32>, vector<8x256xf32> -> vector<16x256xf32>
    %c1_138 = arith.constant 1 : index
    %c0_139 = arith.constant 0 : index
    %c0_140 = arith.constant 0 : index
    %193 = vector.load %arg8[%c1_138, %c0_139, %c0_140] : memref<2x16x256xf32, #tpu.memory_space<vmem>>, vector<1x16x256xf32>
    %194 = vector.shape_cast %193 : vector<1x16x256xf32> to vector<16x256xf32>
    %195 = vector.shape_cast %192 : vector<16x256xf32> to vector<1x16x256xf32>
    tpu.vector_store %arg8[%c1_138, %c0_139, %c0_140], %195 {strides = array<i32>} : memref<2x16x256xf32, #tpu.memory_space<vmem>>, vector<1x16x256xf32>,
    return
  }
  func.func @transform_0(%arg0: i32) -> (i32, i32, i32) {
    %c0_i32 = arith.constant 0 : i32
    %c0_i32_0 = arith.constant 0 : i32
    %c0_i32_1 = arith.constant 0 : i32
    return %arg0, %c0_i32, %c0_i32_0 : i32, i32, i32
  }
  func.func @transform_1(%arg0: i32) -> (i32, i32) {
    %c0_i32 = arith.constant 0 : i32
    %c0_i32_0 = arith.constant 0 : i32
    %c0_i32_1 = arith.constant 0 : i32
    return %c0_i32, %c0_i32_0 : i32, i32
  }
  func.func @transform_2(%arg0: i32) -> (i32, i32) {
    %c0_i32 = arith.constant 0 : i32
    %c0_i32_0 = arith.constant 0 : i32
    %c0_i32_1 = arith.constant 0 : i32
    return %c0_i32, %c0_i32_0 : i32, i32
  }
  func.func @transform_3(%arg0: i32) -> (i32, i32) {
    %c0_i32 = arith.constant 0 : i32
    %c0_i32_0 = arith.constant 0 : i32
    %c0_i32_1 = arith.constant 0 : i32
    return %c0_i32, %c0_i32_0 : i32, i32
  }
  func.func @transform_4(%arg0: i32) -> (i32, i32, i32) {
    %c0_i32 = arith.constant 0 : i32
    %c0_i32_0 = arith.constant 0 : i32
    %c0_i32_1 = arith.constant 0 : i32
    %c0_i32_2 = arith.constant 0 : i32
    return %c0_i32, %c0_i32_0, %c0_i32_1 : i32, i32, i32
  }
  func.func @transform_5(%arg0: i32) -> (i32, i32) {
    %c0_i32 = arith.constant 0 : i32
    %c0_i32_0 = arith.constant 0 : i32
    %c0_i32_1 = arith.constant 0 : i32
    return %c0_i32, %c0_i32_0 : i32, i32
  }
  func.func @transform_6(%arg0: i32) -> (i32, i32, i32) {
    %c0_i32 = arith.constant 0 : i32
    %c0_i32_0 = arith.constant 0 : i32
    %c0_i32_1 = arith.constant 0 : i32
    %c0_i32_2 = arith.constant 0 : i32
    return %c0_i32, %c0_i32_0, %c0_i32_1 : i32, i32, i32
  }
  func.func @transform_7(%arg0: i32) -> (i32, i32, i32) {
    %c0_i32 = arith.constant 0 : i32
    %c0_i32_0 = arith.constant 0 : i32
    %c0_i32_1 = arith.constant 0 : i32
    return %arg0, %c0_i32, %c0_i32_0 : i32, i32, i32
  }
}

</mosaic_0001>

<bundles_post_ra>
// kernel: tpu_custom_call.1
= control target key start
LH: loop header
LB: loop body
LE: loop exit
PB: predicated region body
PF: predicated region fallthrough
CT: control target
= control target key end

     0   :  { %12 = vsyncpa [#allocation3], 0  ;;  %s2530_s0 = inlined_call_operand.hbm [shape: f32[2,4,256], index: 0, kind: input, shape index: {}]   ;;  %s2531_s1 = inlined_call_operand.vmem [shape: f32[8,4], index: 1, kind: input, shape index: {}]   ;;  %s2532_s2 = inlined_call_operand.vmem [shape: f32[8,1], index: 2, kind: input, shape index: {}]   ;;  %s2533_s3 = inlined_call_operand.vmem [shape: f32[16,8], index: 3, kind: input, shape index: {}]   ;;  %s2534_s4 = inlined_call_operand.vmem [shape: f32[8,8,8], index: 4, kind: input, shape index: {}]   ;;  %s2535_s5 = inlined_call_operand.vmem [shape: f32[16,1], index: 5, kind: input, shape index: {}]   ;;  %s2536_s6 = inlined_call_operand.hbm [shape: f32[8,1,256], index: 6, kind: input, shape index: {}]   ;;  %s2537_s7 = inlined_call_operand.hbm [shape: f32[2,16,256], index: 7, kind: output, shape index: {}]  }
   0x1   :  { %13 = vsyncpa [#allocation6], 0 }
   0x2   :  { %14 = vsyncpa [#allocation4], 0  ;;  %s2150_s24 = smov [#allocation2]  }
   0x3   :  { %s20_s25 = sshll.u32 %s2150_s24, 4  ;;  %s21_s25 = int_to_ptr.vmem [resolvable:$true] %s20_s25 }
   0x4   :  { %s2092_s26 = scalar_lea.vmem %s21_s25, 256  ;;  %p2097_p1 = scmp.lt.s32.totalorder %s21_s25, %s21_s25 }
   0x5   :  { %p2093_p0 = scmp.ne.s32.totalorder %s21_s25, %s2092_s26  ;;  %p2098_p2 = scmp.lt.s32.totalorder %s2092_s26, %s2092_s26 }
   0x7   :  { %p2099_p3 = por %p2098_p2, %p2097_p1 }
   0x9   :  { %p2100_p4 = pnand %p2099_p3, %p2093_p0 }
   0xb   :  { %2103 = shalt.err (!%p2100_p4)
}
   0xc   :  { %s2151_s27 = smov 128   ;;  %s2152_s28 = smov 8  }
   0xd   :  { %26 = dma.hbm_to_vmem [thread:$0]  %s2530_s0, 256, %s21_s25, [#allocation3], %s2151_s27, %s2151_s27, %s2152_s28  }
   0xe   :  { %s2153_s8 = smov [#allocation5]  }
   0xf   :  { %s42_s9 = sshll.u32 %s2153_s8, 4  ;;  %s43_s9 = int_to_ptr.vmem [resolvable:$true] %s42_s9 }
  0x10   :  { %s2112_s10 = scalar_lea.vmem %s43_s9, 256  ;;  %p2117_p6 = scmp.lt.s32.totalorder %s43_s9, %s43_s9 }
  0x11   :  { %p2113_p5 = scmp.ne.s32.totalorder %s43_s9, %s2112_s10  ;;  %p2118_p7 = scmp.lt.s32.totalorder %s2112_s10, %s2112_s10 }
  0x13   :  { %p2119_p8 = por %p2118_p7, %p2117_p6 }
  0x15   :  { %p2120_p9 = pnand %p2119_p8, %p2113_p5 }
  0x17   :  { %2123 = shalt.err (!%p2120_p9)
}
  0x18   :  { %s2154_s11 = smov 32   ;;  %s2155_s12 = smov 2  }
  0x19   :  { %48 = dma.hbm_to_vmem [thread:$0]  %s2536_s6, 256, %s43_s9, [#allocation6], %s2154_s11, %s2154_s11, %s2155_s12  }
  0x1a   :  { %2144 = dma.done.wait [#allocation3], 256  }
  0x1b   :  { %2145 = vsyncadd [#allocation3], 4294967040 }
  0x1c   :  { %2146 = dma.done.wait [#allocation6], 256  }
  0x1d   :  { %2147 = vsyncadd [#allocation6], 4294967040  ;;  %v2156_v0 = vmov 0.0   ;;  %v2157_v1 = vmov 0   ;;  %v61_v2 = vld [vmem:[#allocation2] sm:$0xff]  ;;  %vm73_vm0 = vcmask 1043456   ;;  %v246_v15 = vlaneseq }
  0x1e   :  { %142 = vmatprep.mubr.f32.mxu0 %v2156_v0  ;;  %2080 = vset.pattern.permute.xlu0 %v2157_v1  ;;  %v58_v3 = vld [vmem:[%s2532_s2] sm:$0xff]  ;;  %v68_v4 = vcombine.high %v61_v2, %v61_v2  ;;  %vm69_vm1 = vcmask 31744   ;;  %vm151_vm2 = vcmask 64512   ;;  %s2159_s18 = smov 127   ;;  %v2247_v14 = vld [vmem:[%s2533_s3 + $0x8] sm:$0xff]  ;;  %s2160_s21 = smov 112  }
  0x1f   :  { %222 = vmatprep.mubr.f32.mxu1 %v2156_v0  ;;  %2081 = vset.pattern.permute.xlu1 %v2157_v1  ;;  %v2222_v5 = vld [vmem:[%s2531_s1] sm:$0xff]  ;;  %s2158_s1 = smov 15   ;;  %s2161_s22 = smov 17   ;;  %v254_v16 = vshrl.u32 %v246_v15, 7  ;;  %v2265_v17 = vand.u32 127, %v246_v15  ;;  %v2284_v33 = vld [vmem:[%s2534_s4 + $0x10] sm:$0xff] }
  0x20   :  { %64 = vperm.xlu0 %2080, %v58_v3   ;;  %2022 = vmatprep.subr.msk.mxu0 %vm73_vm0, %v68_v4  ;;  %v2237_v13 = vld [vmem:[%s2533_s3] sm:$0xff]  ;;  %s2162_s23 = smov 16   ;;  %s2163_s3 = smov 1   ;;  %v450_v20 = vld [vmem:[#allocation5 + $0x4] sm:$0x3]  ;;  %v1058_v45 = vld [vmem:[#allocation2 + $0x8] sm:$0xff] }
  0x21   :  { %2023 = vmatpush1.msk.msra.mxu0 %vm73_vm0, %v61_v2  ;;  %s2164_s24 = smov 113   ;;  %s2165_s25 = smov 111   ;;  %v2267_v18 = vsub.s32 0, %v254_v16  ;;  %v2269_v19 = vsub.s32 1, %v254_v16  ;;  %vm446_vm3 = vcmp.lt.s32.totalorder %v2265_v17, 15  ;;  %vm646_vm4 = vcmp.lt.s32.totalorder %v2265_v17, 127 }
  0x22   :  { %2024 = vmatmul.mubr.msk.f32.vlgmr.msra.gmra.mxu0 %vm69_vm1, %v2222_v5  ;;  %v650_v24 = vld [vmem:[#allocation5 + $0x8] sm:$0x3]  ;;  %v850_v34 = vld [vmem:[#allocation5 + $0xc] sm:$0x3]  ;;  %vm846_vm5 = vcmp.lt.s32.totalorder %v2265_v17, 112  ;;  %v2299_v44 = vld [vmem:[%s2534_s4 + $0x20] sm:$0xff]  ;;  %v1060_v55 = vcombine.high %v1058_v45, %v1058_v45 }
  0x23   :  { %333 = vmatprep.mubr.f32.mxu0 %v2156_v0  ;;  %v455_v22 = vrot.slane %v450_v20, %v2267_v18  ;;  %v459_v23 = vrot.slane %v450_v20, %v2269_v19  ;;  %v655_v31 = vrot.slane %v650_v24, %v2267_v18  ;;  %v659_v32 = vrot.slane %v650_v24, %v2269_v19  ;;  %v251_v43 = vld [vmem:[#allocation5] sm:$0x3]  ;;  %v350_v54 = vld [vmem:[#allocation5 + $0x2] sm:$0x3]  ;;  %v550_v2 = vld [vmem:[#allocation5 + $0x6] sm:$0x3] }
  0x24   :  { %v855_v41 = vrot.slane %v850_v34, %v2267_v18  ;;  %v859_v42 = vrot.slane %v850_v34, %v2269_v19  ;;  %vm248_vm6 = vcmp.lt.s32.totalorder %v2265_v17, 17  ;;  %v256_v49 = vrot.slane %v251_v43, %v2267_v18  ;;  %v2314_v56 = vld [vmem:[%s2534_s4 + $0x30] sm:$0xff]  ;;  %v2331_v3 = vld [vmem:[%s2534_s4] sm:$0xff]  ;;  %v750_v16 = vld [vmem:[#allocation5 + $0xa] sm:$0x3] }
  0x25   :  { %v260_v53 = vrot.slane %v251_v43, %v2269_v19  ;;  %v355_v60 = vrot.slane %v350_v54, %v2267_v18  ;;  %vm346_vm7 = vcmp.lt.s32.totalorder %v2265_v17, 16  ;;  %v359_v1 = vrot.slane %v350_v54, %v2269_v19  ;;  %v2348_v20 = vld [vmem:[%s2534_s4 + $0x8] sm:$0xff] }
  0x26   :  { %vm546_vm8 = vcmp.lt.s32.totalorder %v2265_v17, 1  ;;  %v559_v15 = vrot.slane %v550_v2, %v2269_v19  ;;  %vm746_vm9 = vcmp.lt.s32.totalorder %v2265_v17, 113  ;;  %vm946_vm10 = vcmp.lt.s32.totalorder %v2265_v17, 111 }
  0x9b   :  { %v2229_v6 = vpop.permute.xlu0 %64 }
  0xe2   :  { %v144_v7 = vpop.f32.mrf.mxu0 }
  0xe3   :  { %v145_v8 = vadd.f32 %v144_v7, %v2229_v6 }
  0xe4   :  { %v146_v9 = vpop.f32.mrf.mxu0 }
  0xe5   :  { %v149_v10 = vmax.f32 %v145_v8, 0.0  ;;  %v147_v11 = vadd.f32 %v146_v9, %v2229_v6  ;;  %v555_v9 = vrot.slane %v550_v2, %v2267_v18 }
  0xe7   :  { %v150_v12 = vmax.f32 %v147_v11, 0.0  ;;  %442 = vrot.lane.b32.xlu0 %v149_v10, %s2158_s1 }
  0xe9   :  { %444 = vrot.lane.b32.xlu1 %v150_v12, %s2158_s1  ;;  %188 = vmatprep.subr.mxu1 %v150_v12 }
  0xea   :  { %189 = vmatpush1.msra.mxu1 %v149_v10 }
  0xeb   :  { %644 = vrot.lane.b32.xlu0 %v150_v12, %s2159_s18  ;;  %2025 = vmatmul.mubr.msk.f32.vlgmr.msra.gmra.mxu1 %vm151_vm2, %v2237_v13 }
  0xec   :  { %228 = vmatprep.mubr.f32.mxu1 %v2156_v0 }
  0xed   :  { %642 = vrot.lane.b32.xlu1 %v149_v10, %s2159_s18 }
  0xef   :  { %844 = vrot.lane.b32.xlu0 %v150_v12, %s2160_s21  ;;  %2026 = vmatmul.mubr.msk.f32.gmra.mxu1 %vm151_vm2, %v2247_v14 }
  0xf0   :  { %533 = vmatprep.mubr.f32.mxu1 %v2156_v0 }
  0xf1   :  { %842 = vrot.lane.b32.xlu1 %v149_v10, %s2160_s21 }
  0xf3   :  { %244 = vrot.lane.b32.xlu0 %v150_v12, %s2161_s22 }
  0xf5   :  { %242 = vrot.lane.b32.xlu1 %v149_v10, %s2161_s22 }
  0xf7   :  { %344 = vrot.lane.b32.xlu0 %v150_v12, %s2162_s23 }
  0xf9   :  { %342 = vrot.lane.b32.xlu1 %v149_v10, %s2162_s23 }
  0xfb   :  { %544 = vrot.lane.b32.xlu0 %v150_v12, %s2163_s3 }
  0xfd   :  { %542 = vrot.lane.b32.xlu1 %v149_v10, %s2163_s3 }
  0xff   :  { %744 = vrot.lane.b32.xlu0 %v150_v12, %s2164_s24 }
 0x101   :  { %742 = vrot.lane.b32.xlu1 %v149_v10, %s2164_s24 }
 0x103   :  { %944 = vrot.lane.b32.xlu0 %v150_v12, %s2165_s25 }
 0x105   :  { %942 = vrot.lane.b32.xlu1 %v149_v10, %s2165_s25 }
 0x159   :  { %v443_v21 = vpop.permute.xlu0 %442 }
 0x15b   :  { %v445_v25 = vpop.permute.xlu1 %444 }
 0x15c   :  { %v447_v26 = vsel %vm446_vm3, %v443_v21, %v445_v25  ;;  %v448_v27 = vsel %vm446_vm3, %v445_v25, %v443_v21 }
 0x15d   :  { %v462_v28 = vmul.f32 %v455_v22, %v448_v27  ;;  %v463_v29 = vmul.f32 %v459_v23, %v447_v26  ;;  %v645_v30 = vpop.permute.xlu0 %644  ;;  %v755_v26 = vrot.slane %v750_v16, %v2267_v18  ;;  %v759_v27 = vrot.slane %v750_v16, %v2269_v19 }
 0x15f   :  { %v643_v35 = vpop.permute.xlu1 %642  ;;  %499 = vmatprep.subr.mxu1 %v463_v29  ;;  %v2364_v29 = vld [vmem:[%s2534_s4 + $0x18] sm:$0xff] }
 0x160   :  { %v647_v36 = vsel %vm646_vm4, %v643_v35, %v645_v30  ;;  %v648_v37 = vsel %vm646_vm4, %v645_v30, %v643_v35  ;;  %500 = vmatpush1.msra.mxu1 %v462_v28  ;;  %v950_v28 = vld [vmem:[#allocation5 + $0xe] sm:$0x3] }
 0x161   :  { %v662_v38 = vmul.f32 %v655_v31, %v647_v36  ;;  %v663_v39 = vmul.f32 %v659_v32, %v648_v37  ;;  %v845_v40 = vpop.permute.xlu0 %844  ;;  %2031 = vmatmul.mubr.msk.f32.vlgmr.msra.gmra.mxu1 %vm151_vm2, %v2284_v33  ;;  %v955_v36 = vrot.slane %v950_v28, %v2267_v18  ;;  %v959_v37 = vrot.slane %v950_v28, %v2269_v19 }
 0x162   :  { %733 = vmatprep.mubr.f32.mxu1 %v2156_v0 }
 0x163   :  { %v843_v46 = vpop.permute.xlu1 %842  ;;  %699 = vmatprep.subr.mxu1 %v663_v39 }
 0x164   :  { %v847_v47 = vsel %vm846_vm5, %v843_v46, %v845_v40  ;;  %v848_v48 = vsel %vm846_vm5, %v845_v40, %v843_v46  ;;  %700 = vmatpush1.msra.mxu1 %v662_v38  ;;  %v2379_v38 = vld [vmem:[%s2534_s4 + $0x28] sm:$0xff]  ;;  %v2391_v46 = vld [vmem:[%s2534_s4 + $0x38] sm:$0xff] }
 0x165   :  { %v862_v50 = vmul.f32 %v855_v41, %v847_v47  ;;  %v863_v51 = vmul.f32 %v859_v42, %v848_v48  ;;  %v245_v52 = vpop.permute.xlu0 %244  ;;  %2035 = vmatmul.mubr.msk.f32.vlgmr.msra.gmra.mxu1 %vm151_vm2, %v2299_v44 }
 0x166   :  { %933 = vmatprep.mubr.f32.mxu1 %v2156_v0 }
 0x167   :  { %v243_v57 = vpop.permute.xlu1 %242  ;;  %899 = vmatprep.subr.mxu1 %v863_v51 }
 0x168   :  { %v249_v58 = vsel %vm248_vm6, %v243_v57, %v245_v52  ;;  %v250_v59 = vsel %vm248_vm6, %v245_v52, %v243_v57  ;;  %900 = vmatpush1.msra.mxu1 %v862_v50 }
 0x169   :  { %v263_v61 = vmul.f32 %v256_v49, %v250_v59  ;;  %v264_v62 = vmul.f32 %v260_v53, %v249_v58  ;;  %v345_v63 = vpop.permute.xlu0 %344  ;;  %2039 = vmatmul.mubr.msk.f32.vlgmr.msra.gmra.mxu1 %vm151_vm2, %v2314_v56  ;;  %2042 = vmatprep.subr.msk.mxu1 %vm73_vm0, %v1060_v55 }
 0x16a   :  { %2043 = vmatpush1.msk.msra.mxu1 %vm73_vm0, %v1058_v45  ;;  %1129 = vmatprep.mubr.f32.mxu1 %v2156_v0 }
 0x16b   :  { %v343_v4 = vpop.permute.xlu1 %342  ;;  %299 = vmatprep.subr.mxu0 %v264_v62 }
 0x16c   :  { %v347_v7 = vsel %vm346_vm7, %v343_v4, %v345_v63  ;;  %v348_v8 = vsel %vm346_vm7, %v345_v63, %v343_v4  ;;  %300 = vmatpush1.msra.mxu0 %v263_v61 }
 0x16d   :  { %v362_v10 = vmul.f32 %v355_v60, %v348_v8  ;;  %v363_v11 = vmul.f32 %v359_v1, %v347_v7  ;;  %v545_v12 = vpop.permute.xlu0 %544  ;;  %2044 = vmatmul.mubr.msk.f32.vlgmr.msra.gmra.mxu1 %vm69_vm1, %v2222_v5  ;;  %2027 = vmatmul.mubr.msk.f32.vlgmr.msra.gmra.mxu0 %vm151_vm2, %v2331_v3  ;;  %v1320_v7 = vld [vmem:[#allocation5 + $0x2] sm:$0x3] }
 0x16e   :  { %433 = vmatprep.mubr.f32.mxu0 %v2156_v0  ;;  %1305 = vmatprep.mubr.f32.mxu1 %v2156_v0  ;;  %v1325_v16 = vrot.slane %v1320_v7, %v2267_v18 }
 0x16f   :  { %v543_v21 = vpop.permute.xlu1 %542  ;;  %399 = vmatprep.subr.mxu0 %v363_v11 }
 0x170   :  { %v547_v5 = vsel %vm546_vm8, %v543_v21, %v545_v12  ;;  %v548_v22 = vsel %vm546_vm8, %v545_v12, %v543_v21  ;;  %400 = vmatpush1.msra.mxu0 %v362_v10  ;;  %v1329_v21 = vrot.slane %v1320_v7, %v2269_v19 }
 0x171   :  { %v562_v23 = vmul.f32 %v555_v9, %v548_v22  ;;  %v563_v24 = vmul.f32 %v559_v15, %v547_v5  ;;  %v745_v25 = vpop.permute.xlu0 %744  ;;  %2029 = vmatmul.mubr.msk.f32.vlgmr.msra.gmra.mxu0 %vm151_vm2, %v2348_v20  ;;  %v1417_v5 = vld [vmem:[#allocation5 + $0x4] sm:$0x3] }
 0x172   :  { %633 = vmatprep.mubr.f32.mxu0 %v2156_v0  ;;  %v1422_v28 = vrot.slane %v1417_v5, %v2267_v18 }
 0x173   :  { %v743_v30 = vpop.permute.xlu1 %742  ;;  %599 = vmatprep.subr.mxu0 %v563_v24 }
 0x174   :  { %v747_v31 = vsel %vm746_vm9, %v743_v30, %v745_v25  ;;  %v748_v32 = vsel %vm746_vm9, %v745_v25, %v743_v30  ;;  %600 = vmatpush1.msra.mxu0 %v562_v23  ;;  %v1426_v30 = vrot.slane %v1417_v5, %v2269_v19 }
 0x175   :  { %v762_v34 = vmul.f32 %v755_v26, %v747_v31  ;;  %v763_v35 = vmul.f32 %v759_v27, %v748_v32  ;;  %2033 = vmatmul.mubr.msk.f32.vlgmr.msra.gmra.mxu0 %vm151_vm2, %v2364_v29  ;;  %v945_v39 = vpop.permute.xlu0 %944  ;;  %v1514_v31 = vld [vmem:[#allocation5 + $0x6] sm:$0x3] }
 0x176   :  { %833 = vmatprep.mubr.f32.mxu0 %v2156_v0 }
 0x177   :  { %v943_v40 = vpop.permute.xlu1 %942  ;;  %799 = vmatprep.subr.mxu0 %v763_v35 }
 0x178   :  { %v947_v41 = vsel %vm946_vm10, %v943_v40, %v945_v39  ;;  %v948_v42 = vsel %vm946_vm10, %v945_v39, %v943_v40  ;;  %800 = vmatpush1.msra.mxu0 %v762_v34  ;;  %v1519_v40 = vrot.slane %v1514_v31, %v2267_v18 }
 0x179   :  { %v962_v43 = vmul.f32 %v955_v36, %v947_v41  ;;  %v963_v45 = vmul.f32 %v959_v37, %v948_v42  ;;  %2037 = vmatmul.mubr.msk.f32.vlgmr.msra.gmra.mxu0 %vm151_vm2, %v2379_v38  ;;  %v1523_v41 = vrot.slane %v1514_v31, %v2269_v19 }
 0x17a   :  { %1033 = vmatprep.mubr.f32.mxu0 %v2156_v0 }
 0x17b   :  { %999 = vmatprep.subr.mxu0 %v963_v45 }
 0x17c   :  { %1000 = vmatpush1.msra.mxu0 %v962_v43 }
 0x17d   :  { %2041 = vmatmul.mubr.msk.f32.vlgmr.msra.gmra.mxu0 %vm151_vm2, %v2391_v46 }
 0x17e   :  { %1202 = vmatprep.mubr.f32.mxu0 %v2156_v0 }
 0x1ab   :  { %v2396_v47 = vpop.f32.mrf.mxu1 }
 0x1ad   :  { %v2398_v48 = vpop.f32.mrf.mxu1 }
 0x1af   :  { %v2400_v49 = vpop.f32.mrf.mxu1 }
 0x1b1   :  { %v2402_v50 = vpop.f32.mrf.mxu1 }
 0x221   :  { %v2404_v51 = vpop.f32.mrf.mxu1 }
 0x223   :  { %v2406_v52 = vpop.f32.mrf.mxu1 }
 0x225   :  { %v2408_v53 = vpop.f32.mrf.mxu1 }
 0x227   :  { %v2410_v54 = vpop.f32.mrf.mxu1 }
 0x229   :  { %v2412_v55 = vpop.f32.mrf.mxu1 }
 0x22b   :  { %v2414_v57 = vpop.f32.mrf.mxu1 }
 0x22d   :  { %v1131_v58 = vpop.f32.mrf.mxu1 }
 0x22e   :  { %v1132_v59 = vadd.f32 %v1131_v58, %v2229_v6 }
 0x22f   :  { %v1133_v60 = vpop.f32.mrf.mxu1 }
 0x230   :  { %v1136_v61 = vmax.f32 %v1132_v59, 0.0  ;;  %v1134_v62 = vadd.f32 %v1133_v60, %v2229_v6  ;;  %v60_v6 = vld [vmem:[%s2535_s5 + $0x8] sm:$0xff] }
 0x232   :  { %v1137_v63 = vmax.f32 %v1134_v62, 0.0  ;;  %1217 = vrot.lane.b32.xlu1 %v1136_v61, %s2161_s22 }
 0x234   :  { %1219 = vrot.lane.b32.xlu0 %v1137_v63, %s2161_s22  ;;  %1168 = vmatprep.subr.mxu0 %v1137_v63 }
 0x235   :  { %1169 = vmatpush1.msra.mxu0 %v1136_v61 }
 0x236   :  { %1314 = vrot.lane.b32.xlu1 %v1136_v61, %s2162_s23  ;;  %2045 = vmatmul.mubr.msk.f32.vlgmr.msra.gmra.mxu0 %vm151_vm2, %v2237_v13  ;;  %v59_v13 = vld [vmem:[%s2535_s5] sm:$0xff]  ;;  %s2166_s5 = smov [#allocation7]  }
 0x237   :  { %1208 = vmatprep.mubr.f32.mxu0 %v2156_v0 }
 0x238   :  { %1316 = vrot.lane.b32.xlu0 %v1137_v63, %s2162_s23 }
 0x23a   :  { %1411 = vrot.lane.b32.xlu1 %v1136_v61, %s2158_s1  ;;  %2046 = vmatmul.mubr.msk.f32.gmra.mxu0 %vm151_vm2, %v2247_v14  ;;  %v1223_v14 = vld [vmem:[#allocation5] sm:$0x3] }
 0x23b   :  { %1499 = vmatprep.mubr.f32.mxu0 %v2156_v0  ;;  %v1228_v2 = vrot.slane %v1223_v14, %v2267_v18  ;;  %v1232_v4 = vrot.slane %v1223_v14, %v2269_v19  ;;  %v335_v14 = vpop.f32.mrf.mxu0 }
 0x23c   :  { %1413 = vrot.lane.b32.xlu0 %v1137_v63, %s2158_s1 }
 0x23e   :  { %1508 = vrot.lane.b32.xlu1 %v1136_v61, %s2163_s3 }
 0x240   :  { %1510 = vrot.lane.b32.xlu0 %v1137_v63, %s2163_s3 }
 0x242   :  { %1605 = vrot.lane.b32.xlu1 %v1136_v61, %s2159_s18 }
 0x244   :  { %1607 = vrot.lane.b32.xlu0 %v1137_v63, %s2159_s18  ;;  %s2009_s18 = sshll.u32 %s2166_s5, 4  ;;  %s2010_s18 = int_to_ptr.vmem [resolvable:$true] %s2009_s18 }
 0x245   :  { %s2124_s19 = scalar_lea.vmem %s2010_s18, 1024  ;;  %p2129_p11 = scmp.lt.s32.totalorder %s2010_s18, %s2010_s18 }
 0x246   :  { %1702 = vrot.lane.b32.xlu1 %v1136_v61, %s2164_s24  ;;  %p2125_p10 = scmp.ne.s32.totalorder %s2010_s18, %s2124_s19  ;;  %p2130_p12 = scmp.lt.s32.totalorder %s2124_s19, %s2124_s19 }
 0x248   :  { %1704 = vrot.lane.b32.xlu0 %v1137_v63, %s2164_s24  ;;  %p2131_p13 = por %p2130_p12, %p2129_p11 }
 0x24a   :  { %1799 = vrot.lane.b32.xlu1 %v1136_v61, %s2160_s21  ;;  %p2132_p0 = pnand %p2131_p13, %p2125_p10 }
 0x24c   :  { %1801 = vrot.lane.b32.xlu0 %v1137_v63, %s2160_s21 }
 0x24e   :  { %1896 = vrot.lane.b32.xlu1 %v1136_v61, %s2165_s25 }
 0x250   :  { %1898 = vrot.lane.b32.xlu0 %v1137_v63, %s2165_s25 }
 0x252   :  { %237 = vperm.xlu1 %2081, %v60_v6  }
 0x254   :  { %1044 = vperm.xlu0 %2080, %v59_v13  }
 0x2a4   :  { %v1218_v1 = vpop.permute.xlu1 %1217 }
 0x2a6   :  { %v1220_v8 = vpop.permute.xlu0 %1219 }
 0x2a7   :  { %v1221_v9 = vsel %vm248_vm6, %v1218_v1, %v1220_v8  ;;  %v1222_v10 = vsel %vm248_vm6, %v1220_v8, %v1218_v1  ;;  %v1805_v8 = vld [vmem:[#allocation5 + $0xc] sm:$0x3] }
 0x2a8   :  { %v1235_v11 = vmul.f32 %v1228_v2, %v1222_v10  ;;  %v1236_v12 = vmul.f32 %v1232_v4, %v1221_v9  ;;  %v1315_v15 = vpop.permute.xlu1 %1314  ;;  %v1810_v5 = vrot.slane %v1805_v8, %v2267_v18 }
 0x2aa   :  { %v1317_v22 = vpop.permute.xlu0 %1316  ;;  %1271 = vmatprep.subr.mxu1 %v1236_v12  ;;  %v337_v12 = vpop.f32.mrf.mxu0 }
 0x2ab   :  { %v1318_v23 = vsel %vm346_vm7, %v1315_v15, %v1317_v22  ;;  %v1319_v24 = vsel %vm346_vm7, %v1317_v22, %v1315_v15  ;;  %1272 = vmatpush1.msra.mxu1 %v1235_v11  ;;  %v1902_v22 = vld [vmem:[#allocation5 + $0xe] sm:$0x3] }
 0x2ac   :  { %v1332_v25 = vmul.f32 %v1325_v16, %v1319_v24  ;;  %v1333_v26 = vmul.f32 %v1329_v21, %v1318_v23  ;;  %v1412_v27 = vpop.permute.xlu1 %1411  ;;  %2047 = vmatmul.mubr.msk.f32.vlgmr.msra.gmra.mxu1 %vm151_vm2, %v2331_v3  ;;  %v1611_v3 = vld [vmem:[#allocation5 + $0x8] sm:$0x3]  ;;  %v1911_v31 = vrot.slane %v1902_v22, %v2269_v19 }
 0x2ad   :  { %1402 = vmatprep.mubr.f32.mxu1 %v2156_v0  ;;  %v1616_v61 = vrot.slane %v1611_v3, %v2267_v18  ;;  %v1620_v62 = vrot.slane %v1611_v3, %v2269_v19 }
 0x2ae   :  { %v1414_v32 = vpop.permute.xlu0 %1413  ;;  %1368 = vmatprep.subr.mxu1 %v1333_v26  ;;  %v435_v26 = vpop.f32.mrf.mxu0 }
 0x2af   :  { %v1415_v34 = vsel %vm446_vm3, %v1412_v27, %v1414_v32  ;;  %v1416_v35 = vsel %vm446_vm3, %v1414_v32, %v1412_v27  ;;  %1369 = vmatpush1.msra.mxu1 %v1332_v25 }
 0x2b0   :  { %v1429_v36 = vmul.f32 %v1422_v28, %v1416_v35  ;;  %v1430_v37 = vmul.f32 %v1426_v30, %v1415_v34  ;;  %v1509_v39 = vpop.permute.xlu1 %1508  ;;  %2049 = vmatmul.mubr.msk.f32.vlgmr.msra.gmra.mxu1 %vm151_vm2, %v2348_v20  ;;  %v1708_v20 = vld [vmem:[#allocation5 + $0xa] sm:$0x3]  ;;  %v1907_v30 = vrot.slane %v1902_v22, %v2267_v18 }
 0x2b1   :  { %1596 = vmatprep.mubr.f32.mxu1 %v2156_v0  ;;  %v1713_v7 = vrot.slane %v1708_v20, %v2267_v18 }
 0x2b2   :  { %v1511_v42 = vpop.permute.xlu0 %1510  ;;  %1465 = vmatprep.subr.mxu0 %v1430_v37 }
 0x2b3   :  { %v1512_v43 = vsel %vm546_vm8, %v1509_v39, %v1511_v42  ;;  %v1513_v45 = vsel %vm546_vm8, %v1511_v42, %v1509_v39  ;;  %1466 = vmatpush1.msra.mxu0 %v1429_v36  ;;  %v437_v36 = vpop.f32.mrf.mxu0 }
 0x2b4   :  { %v1526_v58 = vmul.f32 %v1519_v40, %v1513_v45  ;;  %v1527_v59 = vmul.f32 %v1523_v41, %v1512_v43  ;;  %v1606_v60 = vpop.permute.xlu1 %1605  ;;  %2051 = vmatmul.mubr.msk.f32.vlgmr.msra.gmra.mxu0 %vm151_vm2, %v2284_v33  ;;  %v1717_v33 = vrot.slane %v1708_v20, %v2269_v19 }
 0x2b5   :  { %1693 = vmatprep.mubr.f32.mxu0 %v2156_v0 }
 0x2b6   :  { %v1608_v63 = vpop.permute.xlu0 %1607  ;;  %1562 = vmatprep.subr.mxu1 %v1527_v59 }
 0x2b7   :  { %v1609_v6 = vsel %vm646_vm4, %v1606_v60, %v1608_v63  ;;  %v1610_v13 = vsel %vm646_vm4, %v1608_v63, %v1606_v60  ;;  %1563 = vmatpush1.msra.mxu1 %v1526_v58 }
 0x2b8   :  { %v1623_v1 = vmul.f32 %v1616_v61, %v1609_v6  ;;  %v1624_v2 = vmul.f32 %v1620_v62, %v1610_v13  ;;  %v1703_v4 = vpop.permute.xlu1 %1702  ;;  %2053 = vmatmul.mubr.msk.f32.vlgmr.msra.gmra.mxu1 %vm151_vm2, %v2364_v29  ;;  %v1814_v29 = vrot.slane %v1805_v8, %v2269_v19  ;;  %v635_v19 = vpop.f32.mrf.mxu0 }
 0x2b9   :  { %1790 = vmatprep.mubr.f32.mxu1 %v2156_v0 }
 0x2ba   :  { %v1705_v9 = vpop.permute.xlu0 %1704  ;;  %1659 = vmatprep.subr.mxu0 %v1624_v2 }
 0x2bb   :  { %v1706_v10 = vsel %vm746_vm9, %v1703_v4, %v1705_v9  ;;  %v1707_v11 = vsel %vm746_vm9, %v1705_v9, %v1703_v4  ;;  %1660 = vmatpush1.msra.mxu0 %v1623_v1 }
 0x2bc   :  { %v1720_v15 = vmul.f32 %v1713_v7, %v1706_v10  ;;  %v1721_v16 = vmul.f32 %v1717_v33, %v1707_v11  ;;  %v1800_v21 = vpop.permute.xlu1 %1799  ;;  %2055 = vmatmul.mubr.msk.f32.vlgmr.msra.gmra.mxu0 %vm151_vm2, %v2299_v44 }
 0x2bd   :  { %1887 = vmatprep.mubr.f32.mxu0 %v2156_v0 }
 0x2be   :  { %v1802_v23 = vpop.permute.xlu0 %1801  ;;  %1756 = vmatprep.subr.mxu1 %v1721_v16 }
 0x2bf   :  { %v1803_v24 = vsel %vm846_vm5, %v1800_v21, %v1802_v23  ;;  %v1804_v25 = vsel %vm846_vm5, %v1802_v23, %v1800_v21  ;;  %1757 = vmatpush1.msra.mxu1 %v1720_v15 }
 0x2c0   :  { %v1817_v27 = vmul.f32 %v1810_v5, %v1803_v24  ;;  %v1818_v28 = vmul.f32 %v1814_v29, %v1804_v25  ;;  %2057 = vmatmul.mubr.msk.f32.vlgmr.msra.gmra.mxu1 %vm151_vm2, %v2379_v38  ;;  %v1897_v44 = vpop.permute.xlu1 %1896 }
 0x2c1   :  { %1984 = vmatprep.mubr.f32.mxu1 %v2156_v0  ;;  %v637_v0 = vpop.f32.mrf.mxu0 }
 0x2c2   :  { %v1899_v32 = vpop.permute.xlu0 %1898  ;;  %1853 = vmatprep.subr.mxu0 %v1818_v28 }
 0x2c3   :  { %v1900_v34 = vsel %vm946_vm10, %v1897_v44, %v1899_v32  ;;  %v1901_v35 = vsel %vm946_vm10, %v1899_v32, %v1897_v44  ;;  %1854 = vmatpush1.msra.mxu0 %v1817_v27  ;;  %v835_v41 = vpop.f32.mrf.mxu0 }
 0x2c4   :  { %v1914_v37 = vmul.f32 %v1907_v30, %v1900_v34  ;;  %v1915_v18 = vmul.f32 %v1911_v31, %v1901_v35  ;;  %2059 = vmatmul.mubr.msk.f32.vlgmr.msra.gmra.mxu0 %vm151_vm2, %v2314_v56 }
 0x2c5   :  { %v837_v61 = vpop.f32.mrf.mxu0 }
 0x2c6   :  { %1950 = vmatprep.subr.mxu1 %v1915_v18 }
 0x2c7   :  { %1951 = vmatpush1.msra.mxu1 %v1914_v37  ;;  %v1035_v20 = vpop.f32.mrf.mxu0 }
 0x2c8   :  { %2061 = vmatmul.mubr.msk.f32.vlgmr.msra.gmra.mxu1 %vm151_vm2, %v2391_v46 }
 0x2c9   :  { %v1037_v13 = vpop.f32.mrf.mxu0 }
 0x2cd   :  { %v238_v38 = vpop.permute.xlu1 %237 }
 0x2ce   :  { %v240_v39 = vadd.f32 %v238_v38, %v2400_v49  ;;  %v241_v17 = vadd.f32 %v238_v38, %v2402_v50 }
 0x2cf   :  { %v1045_v40 = vpop.permute.xlu0 %1044 }
 0x2d0   :  { %v340_v3 = vadd.f32 %v335_v14, %v240_v39  ;;  %v1047_v42 = vadd.f32 %v1045_v40, %v2396_v47  ;;  %v1048_v43 = vadd.f32 %v1045_v40, %v2398_v48  ;;  %v341_v56 = vadd.f32 %v337_v12, %v241_v17 }
 0x2d2   :  { %v440_v45 = vadd.f32 %v435_v26, %v340_v3  ;;  %v1049_v58 = vmax.f32 %v1047_v42, 0.0  ;;  %v1050_v59 = vmax.f32 %v1048_v43, 0.0  ;;  %v441_v60 = vadd.f32 %v437_v36, %v341_v56 }
 0x2d4   :  { %1053 = vst [vmem:[#allocation7] sm:$0xff] %v1049_v58  ;;  %1054 = vst [vmem:[#allocation7 + $0x8] sm:$0xff] %v1050_v59  ;;  %v540_v46 = vadd.f32 %v2404_v51, %v440_v45  ;;  %v541_v49 = vadd.f32 %v2406_v52, %v441_v60 }
 0x2d6   :  { %v640_v50 = vadd.f32 %v635_v19, %v540_v46  ;;  %v641_v62 = vadd.f32 %v637_v0, %v541_v49 }
 0x2d8   :  { %v740_v63 = vadd.f32 %v2408_v53, %v640_v50  ;;  %v741_v47 = vadd.f32 %v2410_v54, %v641_v62 }
 0x2da   :  { %v840_v48 = vadd.f32 %v835_v41, %v740_v63  ;;  %v841_v6 = vadd.f32 %v837_v61, %v741_v47 }
 0x2dc   :  { %v940_v14 = vadd.f32 %v2412_v55, %v840_v48  ;;  %v941_v1 = vadd.f32 %v2414_v57, %v841_v6 }
 0x2de   :  { %v1040_v2 = vadd.f32 %v1035_v20, %v940_v14  ;;  %v1041_v4 = vadd.f32 %v1037_v13, %v941_v1 }
 0x2e0   :  { %v1051_v7 = vmax.f32 %v1040_v2, 0.0  ;;  %v1052_v51 = vmax.f32 %v1041_v4, 0.0 }
 0x2e2   :  { %1055 = vst [vmem:[#allocation7 + $0x10] sm:$0xff] %v1051_v7  ;;  %1056 = vst [vmem:[#allocation7 + $0x18] sm:$0xff] %v1052_v51 }
 0x2f6   :  { %v1204_v52 = vpop.f32.mrf.mxu0 }
 0x2f7   :  { %v1993_v33 = vadd.f32 %v1204_v52, %v1045_v40 }
 0x2f8   :  { %v1206_v8 = vpop.f32.mrf.mxu0 }
 0x2f9   :  { %v1995_v9 = vmax.f32 %v1993_v33, 0.0  ;;  %v1994_v53 = vadd.f32 %v1206_v8, %v1045_v40 }
 0x2fa   :  { %v1210_v10 = vpop.f32.mrf.mxu0 }
 0x2fb   :  { %2000 = vst [vmem:[#allocation7 + $0x20] sm:$0xff] %v1995_v9  ;;  %v1996_v54 = vmax.f32 %v1994_v53, 0.0  ;;  %v1215_v11 = vadd.f32 %v1210_v10, %v238_v38 }
 0x2fc   :  { %v1212_v55 = vpop.f32.mrf.mxu0 }
 0x2fd   :  { %2001 = vst [vmem:[#allocation7 + $0x28] sm:$0xff] %v1996_v54  ;;  %v1216_v16 = vadd.f32 %v1212_v55, %v238_v38 }
 0x36c   :  { %v1307_v12 = vpop.f32.mrf.mxu1 }
 0x36d   :  { %v1312_v57 = vadd.f32 %v1307_v12, %v1215_v11 }
 0x36e   :  { %v1309_v15 = vpop.f32.mrf.mxu1 }
 0x36f   :  { %v1313_v5 = vadd.f32 %v1309_v15, %v1216_v16 }
 0x370   :  { %v1404_v21 = vpop.f32.mrf.mxu1 }
 0x371   :  { %v1409_v29 = vadd.f32 %v1404_v21, %v1312_v57 }
 0x372   :  { %v1406_v22 = vpop.f32.mrf.mxu1 }
 0x373   :  { %v1410_v24 = vadd.f32 %v1406_v22, %v1313_v5 }
 0x374   :  { %v1501_v23 = vpop.f32.mrf.mxu0 }
 0x375   :  { %v1506_v25 = vadd.f32 %v1501_v23, %v1409_v29 }
 0x376   :  { %v1503_v26 = vpop.f32.mrf.mxu0 }
 0x377   :  { %v1507_v28 = vadd.f32 %v1503_v26, %v1410_v24 }
 0x378   :  { %v1598_v27 = vpop.f32.mrf.mxu1 }
 0x379   :  { %v1603_v30 = vadd.f32 %v1598_v27, %v1506_v25 }
 0x37a   :  { %v1600_v31 = vpop.f32.mrf.mxu1 }
 0x37b   :  { %v1604_v32 = vadd.f32 %v1600_v31, %v1507_v28 }
 0x37c   :  { %v1695_v44 = vpop.f32.mrf.mxu0 }
 0x37d   :  { %v1700_v34 = vadd.f32 %v1695_v44, %v1603_v30 }
 0x37e   :  { %v1697_v35 = vpop.f32.mrf.mxu0 }
 0x37f   :  { %v1701_v37 = vadd.f32 %v1697_v35, %v1604_v32 }
 0x380   :  { %v1792_v36 = vpop.f32.mrf.mxu1 }
 0x381   :  { %v1797_v18 = vadd.f32 %v1792_v36, %v1700_v34 }
 0x382   :  { %v1794_v19 = vpop.f32.mrf.mxu1 }
 0x383   :  { %v1798_v39 = vadd.f32 %v1794_v19, %v1701_v37 }
 0x384   :  { %v1889_v0 = vpop.f32.mrf.mxu0 }
 0x385   :  { %v1894_v17 = vadd.f32 %v1889_v0, %v1797_v18 }
 0x386   :  { %v1891_v38 = vpop.f32.mrf.mxu0 }
 0x387   :  { %v1895_v41 = vadd.f32 %v1891_v38, %v1798_v39 }
 0x388   :  { %v1986_v40 = vpop.f32.mrf.mxu1 }
 0x389   :  { %v1991_v3 = vadd.f32 %v1986_v40, %v1894_v17 }
 0x38a   :  { %v1988_v42 = vpop.f32.mrf.mxu1 }
 0x38b   :  { %v1997_v43 = vmax.f32 %v1991_v3, 0.0  ;;  %v1992_v56 = vadd.f32 %v1988_v42, %v1895_v41 }
 0x38d   :  { %2002 = vst [vmem:[#allocation7 + $0x30] sm:$0xff] %v1997_v43  ;;  %v1998_v45 = vmax.f32 %v1992_v56, 0.0 }
 0x38f   :  { %2003 = vst [vmem:[#allocation7 + $0x38] sm:$0xff] %v1998_v45 }
 0x390   :  { %2135 = shalt.err (!%p2132_p0)
}
 0x391   :  { %s2167_s20 = smov 256  }
 0x392   :  { %2015 = dma.vmem_to_hbm [thread:$0]  %s2010_s18, 1024, %s2537_s7, [#allocation4], %s2167_s20, %s2167_s20, %s2162_s23  }
 0x393   :  { %2148 = dma.done.wait [#allocation4], 1024  }
 0x394   :  { %2149 = vsyncadd [#allocation4], 4294966272 }
 0x395   :  { %2019 = vsyncpa [#allocation3], 1 }
 0x396   :  { %2020 = vsyncpa [#allocation6], 1 }
 0x397   :  { %2021 = vsyncpa [#allocation4], 1 }

</bundles_post_ra>
